<compile_context>
chip_gen: v7x
topology: tpu7x:2x2x1
jax: 0.10.0
libtpu: 0.0.40
codegen_flags: <defaults>
</compile_context>

<pallas_src>
import functools
import math

import jax
import jax.numpy as jnp
from jax import lax
from jax.experimental import pallas as pl
from jax.experimental.pallas import tpu as pltpu

_LANES = 128        # lane width of a vreg
_ACC_ROWS = 64      # resident accumulator rows -> 8 independent (8,128) chains
_CHUNK_ROWS = 512   # rows processed per inner-loop step (bounds f32 temporaries)


def _bce(x, t):
    """Numerically stable BCE-with-logits per element (f32)."""
    return jnp.maximum(x, 0.0) - x * t + jnp.log1p(jnp.exp(-jnp.abs(x)))


def _bce_sum_kernel(x_ref, t_ref, out_ref, acc_ref, *, r, tr, nb, n_inner, chunk):
    i = pl.program_id(0)          # slab index (parallel / core_parallel axis)
    j = pl.program_id(1)          # reduction step within the slab
    blk = i * n_inner + j         # logical row-block id
    n_chunks = tr // chunk

    @pl.when(j == 0)
    def _init():
        acc_ref[...] = jnp.zeros_like(acc_ref)

    def fold(per):
        # (chunk,128) -> (64,128): sublane-aligned groups, pure vreg adds.
        return jnp.sum(per.reshape(chunk // _ACC_ROWS, _ACC_ROWS, _LANES), axis=0)

    zero_acc = jnp.zeros((_ACC_ROWS, _LANES), jnp.float32)

    # ---- hot path: fully in-bounds blocks, no masking at all ---------------
    @pl.when(blk < nb - 1)
    def _full():
        def body(c, acc):
            off = c * chunk
            s = pl.multiple_of(off, chunk)
            x = x_ref[pl.ds(s, chunk), :].astype(jnp.float32)
            t = t_ref[pl.ds(s, chunk), :].astype(jnp.float32)
            return acc + fold(_bce(x, t))

        acc_ref[...] += lax.fori_loop(0, n_chunks, body, zero_acc)

    # ---- last real block: cheap row-only mask, executed once per slab ------
    @pl.when(blk == nb - 1)
    def _last():
        rows_left = r - blk * tr                      # valid rows in this block
        row = lax.broadcasted_iota(jnp.int32, (chunk, _LANES), 0)

        def body(c, acc):
            off = c * chunk
            s = pl.multiple_of(off, chunk)
            x = x_ref[pl.ds(s, chunk), :].astype(jnp.float32)
            t = t_ref[pl.ds(s, chunk), :].astype(jnp.float32)
            per = jnp.where(row < rows_left - off, _bce(x, t), 0.0)
            return acc + fold(per)

        acc_ref[...] += lax.fori_loop(0, n_chunks, body, zero_acc)

    # Duplicated blocks (blk >= nb, only when nb is odd and split over 2 slabs)
    # fall through both branches: no compute, no accumulation.

    @pl.when(j == n_inner - 1)
    def _fin():
        out_ref[...] = jnp.sum(
            acc_ref[...].reshape(_ACC_ROWS // 8, 8, _LANES), axis=0
        ).reshape(1, 8, _LANES)


def _round_up(a, m):
    return -(-a // m) * m


def _default_block_rows():
    """Generation-aware tile height: larger on 128 MiB VMEM parts (v5e/v6e),
    capped for v7x (64 MiB VMEM per TensorCore)."""
    try:
        info = pltpu.get_tpu_info()
        vmem = int(getattr(info, "vmem_capacity_bytes", 0))
        if vmem >= 96 * 1024 * 1024:
            return 16384
    except Exception:
        pass
    return 8192


def binary_loss(model_output, targets, *, block_rows=None):
    """Pallas implementation of Binary_Loss.forward (BCEWithLogitsLoss, mean)."""
    assert model_output.shape == targets.shape, \
        "model_output & targets shapes don't match"

    total = math.prod(model_output.shape)
    x = model_output.reshape(-1)
    t = targets.reshape(-1)

    r = total // _LANES                     # complete 128-lane rows
    tail = total - r * _LANES               # <128 leftover elements

    # Tail handled in plain JAX: avoids a full-array pad (one extra HBM
    # read+write pass per input) for unaligned element counts.
    tail_sum = jnp.float32(0.0)
    if tail:
        xt = x[r * _LANES:].astype(jnp.float32)
        tt = t[r * _LANES:].astype(jnp.float32)
        tail_sum = jnp.sum(_bce(xt, tt))

    if r == 0:
        # Degenerate tiny input (< 128 elements): pure-JAX path.
        return tail_sum / jnp.float32(total)

    if total != r * _LANES:
        x = x[: r * _LANES]                 # prefix slice (unaligned case only)
        t = t[: r * _LANES]
    x2 = x.reshape(r, _LANES)               # free reshape in the aligned case
    t2 = t.reshape(r, _LANES)

    if block_rows is None:
        block_rows = _default_block_rows()
    tr = min(int(block_rows), _round_up(r, _ACC_ROWS))
    tr = max(_ACC_ROWS, _round_up(tr, _ACC_ROWS))
    if tr > _CHUNK_ROWS:
        tr = _round_up(tr, _CHUNK_ROWS)     # guarantee tr % chunk == 0
    chunk = min(tr, _CHUNK_ROWS)
    nb = -(-r // tr)                        # number of real row blocks

    # Two slabs so both v7x TensorCores get work (neutral on 1-TC chips).
    n_par = 2 if nb >= 2 else 1
    n_inner = -(-nb // n_par)

    def in_map(i, j):
        # Clamp so the (rare) duplicated iteration re-points at block nb-1;
        # Pallas skips the DMA when the block index is unchanged and the
        # kernel skips its compute via pl.when.
        return (jnp.minimum(i * n_inner + j, nb - 1), 0)

    kernel = functools.partial(_bce_sum_kernel, r=r, tr=tr, nb=nb,
                               n_inner=n_inner, chunk=chunk)

    # Double-buffered native-dtype input tiles + generous headroom for the
    # chunked f32 temporaries, accumulator and output blocks.
    in_tile_bytes = tr * _LANES * (x2.dtype.itemsize + t2.dtype.itemsize)
    vmem_limit = min(max(32 * 1024 * 1024, 2 * in_tile_bytes + 8 * 1024 * 1024),
                     100 * 1024 * 1024)

    def run(first_axis_sem):
        return pl.pallas_call(
            kernel,
            out_shape=jax.ShapeDtypeStruct((n_par, 8, _LANES), jnp.float32),
            grid_spec=pltpu.PrefetchScalarGridSpec(
                num_scalar_prefetch=0,
                grid=(n_par, n_inner),
                in_specs=[
                    # TODO(synk): sweep pipeline_mode=pl.Buffered(3) if a trace
                    # shows exposed DMA at slab boundaries on v7x.
                    pl.BlockSpec((tr, _LANES), in_map),
                    pl.BlockSpec((tr, _LANES), in_map),
                ],
                out_specs=pl.BlockSpec((1, 8, _LANES), lambda i, j: (i, 0, 0)),
                scratch_shapes=[pltpu.VMEM((_ACC_ROWS, _LANES), jnp.float32)],
            ),
            compiler_params=pltpu.CompilerParams(
                dimension_semantics=(first_axis_sem, pltpu.ARBITRARY),
                vmem_limit_bytes=vmem_limit,
            ),
        )(x2, t2)

    if n_par > 1:
        try:
            partials = run(pltpu.CORE_PARALLEL)   # real 2-TC split on v7x
        except Exception:
            partials = run(pltpu.PARALLEL)        # single-TC / older toolchains
    else:
        partials = run(pltpu.ARBITRARY)

    # Final tiny cross-lane reduction + mean in plain JAX (one-time cost).
    return (jnp.sum(partials) + tail_sum) / jnp.float32(total)


def _reference(model_output, targets):
    x = model_output.astype(jnp.float32)
    t = targets.astype(jnp.float32)
    per = -(t * jax.nn.log_sigmoid(x) + (1.0 - t) * jax.nn.log_sigmoid(-x))
    return jnp.mean(per)


if __name__ == "__main__":
    key = jax.random.PRNGKey(0)
    k1, k2, k3, k4 = jax.random.split(key, 4)

    # 1) [N, C, H, W] logits / binary targets, 128-aligned element count.
    x = jax.random.normal(k1, (2, 4, 16, 16), dtype=jnp.float32)
    t = (jax.random.uniform(k2, (2, 4, 16, 16)) > 0.5).astype(jnp.float32)
    out = jax.block_until_ready(binary_loss(x, t))
    ref = _reference(x, t)
    assert jnp.allclose(out, ref, atol=1e-5, rtol=1e-5), (out, ref)

    # 2) Non-128-aligned element count: exercises the JAX tail path (no pad).
    x2 = jax.random.normal(k3, (3, 5, 7, 9), dtype=jnp.float32)
    t2 = (jax.random.uniform(k4, (3, 5, 7, 9)) > 0.5).astype(jnp.float32)
    out2 = jax.block_until_ready(binary_loss(x2, t2))
    ref2 = _reference(x2, t2)
    assert jnp.allclose(out2, ref2, atol=1e-5, rtol=1e-5), (out2, ref2)

    # 3) Small block_rows: multi-block accumulation, 2-slab parallel grid,
    #    last-block row-overhang mask and the duplicated-block skip path.
    x3 = jax.random.normal(k1, (4, 3, 40, 40), dtype=jnp.float32)
    t3 = (jax.random.uniform(k4, (4, 3, 40, 40)) > 0.5).astype(jnp.float32)
    out3 = jax.block_until_ready(binary_loss(x3, t3, block_rows=64))
    ref3 = _reference(x3, t3)
    assert jnp.allclose(out3, ref3, atol=1e-5, rtol=1e-5), (out3, ref3)

    # 4) Degenerate tiny input (< 128 elements): pure-JAX fallback path.
    x4 = jax.random.normal(k2, (3, 5), dtype=jnp.float32)
    t4 = (jax.random.uniform(k3, (3, 5)) > 0.5).astype(jnp.float32)
    out4 = jax.block_until_ready(binary_loss(x4, t4))
    ref4 = _reference(x4, t4)
    assert jnp.allclose(out4, ref4, atol=1e-5, rtol=1e-5), (out4, ref4)

    # 5) bf16 logits: native-dtype DMA with f32 in-kernel accumulation.
    x5 = jax.random.normal(k3, (2, 4, 16, 16), dtype=jnp.bfloat16)
    t5 = (jax.random.uniform(k1, (2, 4, 16, 16)) > 0.5).astype(jnp.bfloat16)
    out5 = jax.block_until_ready(binary_loss(x5, t5))
    ref5 = _reference(x5, t5)
    assert jnp.allclose(out5, ref5, atol=2e-3, rtol=2e-3), (out5, ref5)

    print("KERNEL_OK")
</pallas_src>

<mosaic_0001>
module attributes {stable_mosaic.version = 11 : i64} {
  func.func @_bce_sum_kernel(%arg0: i32, %arg1: i32, %arg2: memref<64x128xf32, #tpu.memory_space<vmem>>, %arg3: memref<64x128xf32, #tpu.memory_space<vmem>>, %arg4: memref<1x8x128xf32, #tpu.memory_space<vmem>>, %arg5: memref<64x128xf32, #tpu.memory_space<vmem>>) attributes {dimension_semantics = [#tpu.dimension_semantics<arbitrary>, #tpu.dimension_semantics<arbitrary>], iteration_bounds = array<i64: 1, 1>, scalar_prefetch = 0 : i64, scratch_operands = 1 : i64, tpu.core_type = #tpu.core_type<tc>, window_params = [{transform_indices = @transform_0, window_bounds = array<i64: 64, 128>}, {transform_indices = @transform_1, window_bounds = array<i64: 64, 128>}, {transform_indices = @transform_2, window_bounds = array<i64: 1, 8, 128>}]} {
    %c1_i32 = arith.constant 1 : i32
    %0 = arith.muli %arg0, %c1_i32 : i32
    %1 = arith.addi %0, %arg1 : i32
    %c0_i32 = arith.constant 0 : i32
    %2 = arith.cmpi eq, %arg1, %c0_i32 : i32
    %3 = arith.extui %2 : i1 to i32
    %c0_i32_0 = arith.constant 0 : i32
    %4 = arith.cmpi ne, %3, %c0_i32_0 : i32
    scf.if %4 {
      %cst_7 = arith.constant 0.000000e+00 : f32
      %15 = vector.broadcast %cst_7 : f32 to vector<64x128xf32>
      %c0 = arith.constant 0 : index
      %c0_8 = arith.constant 0 : index
      %16 = vector.load %arg5[%c0, %c0_8] : memref<64x128xf32, #tpu.memory_space<vmem>>, vector<64x128xf32>
      tpu.vector_store %arg5[%c0, %c0_8], %15 {strides = array<i32>} : memref<64x128xf32, #tpu.memory_space<vmem>>, vector<64x128xf32>,
    } else {
    }
    %cst = arith.constant 0.000000e+00 : f32
    %5 = vector.broadcast %cst : f32 to vector<64x128xf32>
    %c0_i32_1 = arith.constant 0 : i32
    %6 = arith.cmpi slt, %1, %c0_i32_1 : i32
    %7 = arith.extui %6 : i1 to i32
    %c0_i32_2 = arith.constant 0 : i32
    %8 = arith.cmpi ne, %7, %c0_i32_2 : i32
    scf.if %8 {
      %c0 = arith.constant 0 : index
      %c0_7 = arith.constant 0 : index
      %15 = vector.load %arg5[%c0, %c0_7] : memref<64x128xf32, #tpu.memory_space<vmem>>, vector<64x128xf32>
      %c0_i32_8 = arith.constant 0 : i32
      %c64_i32 = arith.constant 64 : i32
      %16 = arith.muli %c0_i32_8, %c64_i32 : i32
      %17 = tpu.assume_multiple %16, 64 : i32
      %18 = arith.index_cast %17 : i32 to index
      %c0_9 = arith.constant 0 : index
      %19 = vector.load %arg2[%18, %c0_9] : memref<64x128xf32, #tpu.memory_space<vmem>>, vector<64x128xf32>
      %20 = arith.index_cast %17 : i32 to index
      %c0_10 = arith.constant 0 : index
      %21 = vector.load %arg3[%20, %c0_10] : memref<64x128xf32, #tpu.memory_space<vmem>>, vector<64x128xf32>
      %cst_11 = arith.constant 0.000000e+00 : f32
      %22 = vector.broadcast %cst_11 : f32 to vector<64x128xf32>
      %23 = arith.maximumf %19, %22 : vector<64x128xf32>
      %24 = arith.mulf %19, %21 : vector<64x128xf32>
      %25 = arith.subf %23, %24 : vector<64x128xf32>
      %26 = math.absf %19 : vector<64x128xf32>
      %cst_12 = arith.constant 0.000000e+00 : f32
      %27 = vector.broadcast %cst_12 : f32 to vector<64x128xf32>
      %28 = arith.subf %27, %26 : vector<64x128xf32>
      %29 = math.exp %28 : vector<64x128xf32>
      %30 = math.log1p %29 : vector<64x128xf32>
      %31 = arith.addf %25, %30 : vector<64x128xf32>
      %32 = vector.shape_cast %31 : vector<64x128xf32> to vector<1x64x128xf32>
      %cst_13 = arith.constant dense<0.000000e+00> : vector<64x128xf32>
      %33 = vector.multi_reduction <add>, %32, %cst_13 [0] : vector<1x64x128xf32> to vector<64x128xf32>
      %34 = arith.addf %5, %33 : vector<64x128xf32>
      %c1_i32_14 = arith.constant 1 : i32
      %35 = arith.addf %15, %34 : vector<64x128xf32>
      %c0_15 = arith.constant 0 : index
      %c0_16 = arith.constant 0 : index
      %36 = vector.load %arg5[%c0_15, %c0_16] : memref<64x128xf32, #tpu.memory_space<vmem>>, vector<64x128xf32>
      tpu.vector_store %arg5[%c0_15, %c0_16], %35 {strides = array<i32>} : memref<64x128xf32, #tpu.memory_space<vmem>>, vector<64x128xf32>,
    } else {
    }
    %c0_i32_3 = arith.constant 0 : i32
    %9 = arith.cmpi eq, %1, %c0_i32_3 : i32
    %10 = arith.extui %9 : i1 to i32
    %c0_i32_4 = arith.constant 0 : i32
    %11 = arith.cmpi ne, %10, %c0_i32_4 : i32
    scf.if %11 {
      %c64_i32 = arith.constant 64 : i32
      %15 = arith.muli %1, %c64_i32 : i32
      %c16_i32 = arith.constant 16 : i32
      %16 = arith.subi %c16_i32, %15 : i32
      %17 = tpu.iota {dimensions = array<i32: 0>} : vector<64x128xi32>
      %c0 = arith.constant 0 : index
      %c0_7 = arith.constant 0 : index
      %18 = vector.load %arg5[%c0, %c0_7] : memref<64x128xf32, #tpu.memory_space<vmem>>, vector<64x128xf32>
      %c0_i32_8 = arith.constant 0 : i32
      %c64_i32_9 = arith.constant 64 : i32
      %19 = arith.muli %c0_i32_8, %c64_i32_9 : i32
      %20 = tpu.assume_multiple %19, 64 : i32
      %21 = arith.index_cast %20 : i32 to index
      %c0_10 = arith.constant 0 : index
      %22 = vector.load %arg2[%21, %c0_10] : memref<64x128xf32, #tpu.memory_space<vmem>>, vector<64x128xf32>
      %23 = arith.index_cast %20 : i32 to index
      %c0_11 = arith.constant 0 : index
      %24 = vector.load %arg3[%23, %c0_11] : memref<64x128xf32, #tpu.memory_space<vmem>>, vector<64x128xf32>
      %25 = arith.subi %16, %19 : i32
      %26 = vector.broadcast %25 : i32 to vector<64x128xi32>
      %27 = arith.cmpi slt, %17, %26 : vector<64x128xi32>
      %cst_12 = arith.constant 0.000000e+00 : f32
      %28 = vector.broadcast %cst_12 : f32 to vector<64x128xf32>
      %29 = arith.maximumf %22, %28 : vector<64x128xf32>
      %30 = arith.mulf %22, %24 : vector<64x128xf32>
      %31 = arith.subf %29, %30 : vector<64x128xf32>
      %32 = math.absf %22 : vector<64x128xf32>
      %cst_13 = arith.constant 0.000000e+00 : f32
      %33 = vector.broadcast %cst_13 : f32 to vector<64x128xf32>
      %34 = arith.subf %33, %32 : vector<64x128xf32>
      %35 = math.exp %34 : vector<64x128xf32>
      %36 = math.log1p %35 : vector<64x128xf32>
      %37 = arith.addf %31, %36 : vector<64x128xf32>
      %cst_14 = arith.constant 0.000000e+00 : f32
      %38 = vector.broadcast %cst_14 : f32 to vector<64x128xf32>
      %39 = arith.select %27, %37, %38 : vector<64x128xi1>, vector<64x128xf32>
      %40 = vector.shape_cast %39 : vector<64x128xf32> to vector<1x64x128xf32>
      %cst_15 = arith.constant dense<0.000000e+00> : vector<64x128xf32>
      %41 = vector.multi_reduction <add>, %40, %cst_15 [0] : vector<1x64x128xf32> to vector<64x128xf32>
      %42 = arith.addf %5, %41 : vector<64x128xf32>
      %c1_i32_16 = arith.constant 1 : i32
      %43 = arith.addf %18, %42 : vector<64x128xf32>
      %c0_17 = arith.constant 0 : index
      %c0_18 = arith.constant 0 : index
      %44 = vector.load %arg5[%c0_17, %c0_18] : memref<64x128xf32, #tpu.memory_space<vmem>>, vector<64x128xf32>
      tpu.vector_store %arg5[%c0_17, %c0_18], %43 {strides = array<i32>} : memref<64x128xf32, #tpu.memory_space<vmem>>, vector<64x128xf32>,
    } else {
    }
    %c0_i32_5 = arith.constant 0 : i32
    %12 = arith.cmpi eq, %arg1, %c0_i32_5 : i32
    %13 = arith.extui %12 : i1 to i32
    %c0_i32_6 = arith.constant 0 : i32
    %14 = arith.cmpi ne, %13, %c0_i32_6 : i32
    scf.if %14 {
      %c0 = arith.constant 0 : index
      %c0_7 = arith.constant 0 : index
      %15 = vector.load %arg5[%c0, %c0_7] : memref<64x128xf32, #tpu.memory_space<vmem>>, vector<64x128xf32>
      %16 = vector.shape_cast %15 : vector<64x128xf32> to vector<8x8x128xf32>
      %cst_8 = arith.constant dense<0.000000e+00> : vector<8x128xf32>
      %17 = vector.multi_reduction <add>, %16, %cst_8 [0] : vector<8x8x128xf32> to vector<8x128xf32>
      %18 = vector.shape_cast %17 : vector<8x128xf32> to vector<1x8x128xf32>
      %c0_9 = arith.constant 0 : index
      %c0_10 = arith.constant 0 : index
      %c0_11 = arith.constant 0 : index
      %19 = vector.load %arg4[%c0_9, %c0_10, %c0_11] : memref<1x8x128xf32, #tpu.memory_space<vmem>>, vector<1x8x128xf32>
      tpu.vector_store %arg4[%c0_9, %c0_10, %c0_11], %18 {strides = array<i32>} : memref<1x8x128xf32, #tpu.memory_space<vmem>>, vector<1x8x128xf32>,
    } else {
    }
    return
  }
  func.func @transform_0(%arg0: i32, %arg1: i32) -> (i32, i32) {
    %c1_i32 = arith.constant 1 : i32
    %0 = arith.muli %arg0, %c1_i32 : i32
    %1 = arith.addi %0, %arg1 : i32
    %c0_i32 = arith.constant 0 : i32
    %2 = arith.minsi %1, %c0_i32 : i32
    %c0_i32_0 = arith.constant 0 : i32
    %c0_i32_1 = arith.constant 0 : i32
    return %2, %c0_i32_0 : i32, i32
  }
  func.func @transform_1(%arg0: i32, %arg1: i32) -> (i32, i32) {
    %c1_i32 = arith.constant 1 : i32
    %0 = arith.muli %arg0, %c1_i32 : i32
    %1 = arith.addi %0, %arg1 : i32
    %c0_i32 = arith.constant 0 : i32
    %2 = arith.minsi %1, %c0_i32 : i32
    %c0_i32_0 = arith.constant 0 : i32
    %c0_i32_1 = arith.constant 0 : i32
    return %2, %c0_i32_0 : i32, i32
  }
  func.func @transform_2(%arg0: i32, %arg1: i32) -> (i32, i32, i32) {
    %c0_i32 = arith.constant 0 : i32
    %c0_i32_0 = arith.constant 0 : i32
    %c0_i32_1 = arith.constant 0 : i32
    return %arg0, %c0_i32, %c0_i32_0 : i32, i32, i32
  }
}

</mosaic_0001>

<bundles_post_ra>
// kernel: tpu_custom_call.1
= control target key start
LH: loop header
LB: loop body
LE: loop exit
PB: predicated region body
PF: predicated region fallthrough
CT: control target
= control target key end

     0   :  { %7 = vsyncpa [#allocation4], 0  ;;  %s685_s0 = inlined_call_operand.hbm [shape: f32[16,128], index: 0, kind: input, shape index: {}]   ;;  %s686_s1 = inlined_call_operand.hbm [shape: f32[16,128], index: 1, kind: input, shape index: {}]   ;;  %s687_s2 = inlined_call_operand.hbm [shape: f32[1,8,128], index: 2, kind: output, shape index: {}]  }
   0x1   :  { %8 = vsyncpa [#allocation7], 0 }
   0x2   :  { %9 = vsyncpa [#allocation5], 0 }
   0x3   :  { %20 = vsyncadd [#allocation4], 768  ;;  %s629_s9 = smov [#allocation3]   ;;  %s557_s13 = scalar_lea.hbm %s685_s0, 256 }
   0x4   :  { %s25_s10 = sshll.u32 %s629_s9, 4  ;;  %p558_p0 = scmp.ne.s32.totalorder %s685_s0, %s557_s13  ;;  %s26_s10 = int_to_ptr.vmem [resolvable:$true] %s25_s10 }
   0x5   :  { %p561_p1 = scmp.lt.u32.totalorder %s557_s13, %s685_s0 }
   0x7   :  { %p563_p2 = pnand %p561_p1, %p558_p0 }
   0x9   :  { %566 = shalt.err (!%p563_p2)
}
   0xa   :  { %s567_s18 = scalar_lea.vmem %s26_s10, 256  ;;  %s571_s19 = scalar_lea.vmem %s26_s10, 1024 }
   0xb   :  { %p568_p3 = scmp.ne.s32.totalorder %s26_s10, %s567_s18  ;;  %p572_p4 = scmp.lt.s32.totalorder %s26_s10, %s26_s10 }
   0xc   :  { %p573_p5 = scmp.lt.s32.totalorder %s571_s19, %s567_s18 }
   0xe   :  { %p574_p6 = por %p573_p5, %p572_p4 }
  0x10   :  { %p575_p7 = pnand %p574_p6, %p568_p3 }
  0x12   :  { %578 = shalt.err (!%p575_p7)
}
  0x13   :  { %s630_s20 = smov 128   ;;  %s631_s21 = smov 8  }
  0x14   :  { %31 = dma.hbm_to_vmem [thread:$0]  %s685_s0, 256, %s26_s10, [#allocation4], %s630_s20, %s630_s20, %s631_s21  }
  0x15   :  { %42 = vsyncadd [#allocation7], 768  ;;  %s632_s24 = smov [#allocation6]   ;;  %s579_s28 = scalar_lea.hbm %s686_s1, 256 }
  0x16   :  { %s47_s25 = sshll.u32 %s632_s24, 4  ;;  %p580_p8 = scmp.ne.s32.totalorder %s686_s1, %s579_s28  ;;  %s48_s25 = int_to_ptr.vmem [resolvable:$true] %s47_s25 }
  0x17   :  { %p583_p9 = scmp.lt.u32.totalorder %s579_s28, %s686_s1 }
  0x19   :  { %p585_p10 = pnand %p583_p9, %p580_p8 }
  0x1b   :  { %588 = shalt.err (!%p585_p10)
}
  0x1c   :  { %s589_s5 = scalar_lea.vmem %s48_s25, 256  ;;  %s593_s0 = scalar_lea.vmem %s48_s25, 1024 }
  0x1d   :  { %p590_p11 = scmp.ne.s32.totalorder %s48_s25, %s589_s5  ;;  %p594_p12 = scmp.lt.s32.totalorder %s48_s25, %s48_s25 }
  0x1e   :  { %p595_p13 = scmp.lt.s32.totalorder %s593_s0, %s589_s5 }
  0x20   :  { %p596_p0 = por %p595_p13, %p594_p12 }
  0x22   :  { %p597_p1 = pnand %p596_p0, %p590_p11 }
  0x24   :  { %600 = shalt.err (!%p597_p1)
}
  0x25   :  { %53 = dma.hbm_to_vmem [thread:$0]  %s686_s1, 256, %s48_s25, [#allocation7], %s630_s20, %s630_s20, %s631_s21  }
  0x26   :  { %623 = dma.done.wait [#allocation4], 1024  }
  0x27   :  { %624 = vsyncadd [#allocation4], 4294966272 }
  0x28   :  { %625 = dma.done.wait [#allocation7], 1024  }
  0x29   :  { %626 = vsyncadd [#allocation7], 4294966272  ;;  %v304_v0 = vld [vmem:[#allocation3] sm:$0xff]  ;;  %v305_v1 = vld [vmem:[#allocation3 + $0x8] sm:$0xff]  ;;  %s633_s1 = smov [#allocation8]  }
  0x2a   :  { %v353_v2 = vand.u32 2147483647, %v304_v0  ;;  %v354_v3 = vand.u32 2147483647, %v305_v1  ;;  %v312_v14 = vld [vmem:[#allocation6] sm:$0xff]  ;;  %v313_v15 = vld [vmem:[#allocation6 + $0x8] sm:$0xff] }
  0x2b   :  { %v329_v17 = vmax.f32 %v304_v0, 0.0  ;;  %v337_v18 = vmul.f32 %v312_v14, %v304_v0  ;;  %v330_v21 = vmax.f32 %v305_v1, 0.0  ;;  %v338_v22 = vmul.f32 %v313_v15, %v305_v1  ;;  %s530_s8 = sshll.u32 %s633_s1, 4  ;;  %s531_s8 = int_to_ptr.vmem [resolvable:$true] %s530_s8 }
  0x2c   :  { %v361_v4 = vsub.f32 0.0, %v353_v2  ;;  %v362_v5 = vsub.f32 0.0, %v354_v3  ;;  %s601_s9 = scalar_lea.vmem %s531_s8, 128  ;;  %p606_p3 = scmp.lt.s32.totalorder %s531_s8, %s531_s8 }
  0x2d   :  { %v345_v26 = vsub.f32 %v329_v17, %v337_v18  ;;  %v346_v29 = vsub.f32 %v330_v21, %v338_v22  ;;  %p602_p2 = scmp.ne.s32.totalorder %s531_s8, %s601_s9  ;;  %p607_p4 = scmp.lt.s32.totalorder %s601_s9, %s601_s9 }
  0x2e   :  { %v369_v6 = vmul.f32 1.442695, %v361_v4  ;;  %v371_v7 = vmul.f32 1.442695, %v362_v5 }
  0x2f   :  { %p608_p5 = por %p607_p4, %p606_p3 }
  0x30   :  { %549 = vpow2.f32 %v369_v6 }
  0x31   :  { %551 = vpow2.f32 %v371_v7  ;;  %p609_p6 = pnand %p608_p5, %p602_p2 }
  0x3a   :  { %v550_v8 = vpop.eup %549 }
  0x3b   :  { %v552_v9 = vpop.eup %551  ;;  %v385_v10 = vadd.f32 1.0, %v550_v8  ;;  %v388_v12 = vmul.f32 -0.5, %v550_v8  ;;  %v391_v19 = vand.u32 2147483647, %v550_v8 }
  0x3c   :  { %v394_v11 = vadd.f32 1.0, %v552_v9  ;;  %v397_v13 = vmul.f32 -0.5, %v552_v9  ;;  %v400_v23 = vand.u32 2147483647, %v552_v9 }
  0x3d   :  { %553 = vlog2.f32 %v385_v10  ;;  %v389_v16 = vadd.f32 1.0, %v388_v12  ;;  %vm392_vm0 = vcmp.lt.f32.partialorder %v391_v19, 0.0004427343 }
  0x3e   :  { %555 = vlog2.f32 %v394_v11  ;;  %v398_v20 = vadd.f32 1.0, %v397_v13  ;;  %vm401_vm1 = vcmp.lt.f32.partialorder %v400_v23, 0.0004427343 }
  0x3f   :  { %v390_v24 = vmul.f32 %v550_v8, %v389_v16 }
  0x40   :  { %v399_v27 = vmul.f32 %v552_v9, %v398_v20 }
  0x47   :  { %v554_v25 = vpop.eup %553 }
  0x48   :  { %v556_v28 = vpop.eup %555  ;;  %v387_v30 = vmul.f32 0.6931472, %v554_v25 }
  0x49   :  { %v396_v31 = vmul.f32 0.6931472, %v556_v28 }
  0x4a   :  { %v393_v32 = vsel %vm392_vm0, %v390_v24, %v387_v30 }
  0x4b   :  { %v402_v33 = vsel %vm401_vm1, %v399_v27, %v396_v31  ;;  %v457_v34 = vadd.f32 %v393_v32, %v345_v26 }
  0x4c   :  { %v458_v35 = vadd.f32 %v402_v33, %v346_v29 }
  0x4e   :  { %v516_v36 = vadd.f32 %v458_v35, %v457_v34 }
  0x50   :  { %523 = vst [vmem:[#allocation8] sm:$0xff] %v516_v36 }
  0x51   :  { %612 = shalt.err (!%p609_p6)
}
  0x52   :  { %s613_s12 = scalar_lea.hbm %s687_s2, 128 }
  0x53   :  { %p614_p7 = scmp.ne.s32.totalorder %s687_s2, %s613_s12  ;;  %p617_p8 = scmp.lt.u32.totalorder %s613_s12, %s687_s2 }
  0x55   :  { %p619_p9 = pnand %p617_p8, %p614_p7 }
  0x57   :  { %622 = shalt.err (!%p619_p9)
}
  0x58   :  { %533 = dma.vmem_to_hbm [thread:$0]  %s531_s8, 128, %s687_s2, [#allocation5]  }
  0x59   :  { %627 = dma.done.wait [#allocation5], 128  }
  0x5a   :  { %628 = vsyncadd [#allocation5], 4294967168 }
  0x5b   :  { %537 = vsyncpa [#allocation4], 1 }
  0x5c   :  { %538 = vsyncpa [#allocation7], 1 }
  0x5d   :  { %539 = vsyncpa [#allocation5], 1 }

</bundles_post_ra>
